<compile_context>
chip_gen: v7x
topology: tpu7x:2x2x1
jax: 0.10.0
libtpu: 0.0.40
codegen_flags: <defaults>
</compile_context>

<pallas_src>
import numpy as np
import jax
import jax.numpy as jnp
from jax import lax
from jax.experimental import pallas as pl
from jax.experimental.pallas import tpu as pltpu


# ----------------------------------------------------------------------------
# helpers
# ----------------------------------------------------------------------------
def _round_up(x, m):
    return (x + m - 1) // m * m


# ----------------------------------------------------------------------------
# Fused QKV projection kernel (qk-scale folded into q's epilogue)
# ----------------------------------------------------------------------------
def _make_qkv_kernel(C, scale):
    scale = float(scale)   # plain python float -> jaxpr literal, not a captured const

    def kernel(x_ref, w_ref, b_ref, q_ref, k_ref, v_ref):
        acc = jnp.dot(x_ref[...], w_ref[...],
                      preferred_element_type=jnp.float32) + b_ref[...]
        q_ref[...] = (acc[:, 0 * C:1 * C] * scale).astype(q_ref.dtype)
        k_ref[...] = acc[:, 1 * C:2 * C].astype(k_ref.dtype)
        v_ref[...] = acc[:, 2 * C:3 * C].astype(v_ref.dtype)

    return kernel


def qkv_linear_pallas(x, w, b, scale, *, tm=256):
    """x:(M,C) @ w:(C,3C) + b, split into (q*scale, k, v) with no extra HBM pass."""
    M, C = x.shape
    assert w.shape == (C, 3 * C)
    tm = min(tm, _round_up(M, 8))
    Mp = _round_up(M, tm)
    if Mp != M:
        x = jnp.pad(x, ((0, Mp - M), (0, 0)))
    out_sd = jax.ShapeDtypeStruct((Mp, C), x.dtype)
    q, k, v = pl.pallas_call(
        _make_qkv_kernel(C, scale),
        out_shape=(out_sd, out_sd, out_sd),
        grid=(Mp // tm,),
        in_specs=[
            pl.BlockSpec((tm, C), lambda i: (i, 0)),
            pl.BlockSpec((C, 3 * C), lambda i: (0, 0)),
            pl.BlockSpec((1, 3 * C), lambda i: (0, 0)),
        ],
        out_specs=(
            pl.BlockSpec((tm, C), lambda i: (i, 0)),
            pl.BlockSpec((tm, C), lambda i: (i, 0)),
            pl.BlockSpec((tm, C), lambda i: (i, 0)),
        ),
        compiler_params=pltpu.CompilerParams(dimension_semantics=("parallel",)),
    )(x, w, b.reshape(1, 3 * C))
    if Mp != M:
        q, k, v = q[:M], k[:M], v[:M]
    return q, k, v


# ----------------------------------------------------------------------------
# Halo-tiled neighborhood attention + fused output projection
# ----------------------------------------------------------------------------
def _make_na3d_attn_kernel(spatial, kernel_size, tiles, halo, num_heads, head_dim):
    D, H, W = spatial
    ks_d, ks_h, ks_w = kernel_size
    td, th = tiles
    HD, HH = halo
    rd, rh, rw = ks_d // 2, ks_h // 2, ks_w // 2
    rows = th * W                 # queries per depth plane of the tile
    HHW = HH * W                  # keys per depth plane of the halo slab
    HLs = ks_d * HHW              # keys visible to one query depth plane
    TL = td * rows                # queries per tile
    C = num_heads * head_dim
    NEG = -1e30                   # python float -> literal (no captured constant)

    def kernel(q_ref, k_hbm, v_hbm, wp_ref, bp_ref, o_ref, kbuf, vbuf, sem):
        b = pl.program_id(0)
        ti = pl.program_id(1)
        tj = pl.program_id(2)

        # Clamped halo origin: the union of all (clamped) query windows of this
        # tile fits in a fixed-size slab starting at (d0, h0, 0).
        d0 = jnp.clip(ti * td - rd, 0, D - HD)
        h0 = jnp.clip(tj * th - rh, 0, H - HH)

        ck = pltpu.make_async_copy(
            k_hbm.at[b, pl.ds(d0, HD), pl.ds(h0, HH), :, :], kbuf, sem.at[0])
        cv = pltpu.make_async_copy(
            v_hbm.at[b, pl.ds(d0, HD), pl.ds(h0, HH), :, :], vbuf, sem.at[1])
        ck.start()
        cv.start()

        # ---- (h, w) neighborhood mask, built from iotas while the DMAs fly ----
        # Depth needs no mask: each query depth plane is matched below against
        # exactly its own kd-deep slice of the halo.
        qi = lax.broadcasted_iota(jnp.int32, (rows, 1), 0)
        qh = tj * th + qi // W                      # global query h
        qw = qi % W                                 # global query w
        ki = lax.broadcasted_iota(jnp.int32, (1, HHW), 1)
        khg = h0 + ki // W                          # global key h
        kwg = ki % W                                # global key w
        sh = jnp.clip(qh - rh, 0, H - ks_h)         # clamped window starts
        sw = jnp.clip(qw - rw, 0, W - ks_w)
        inside = ((khg >= sh) & (khg < sh + ks_h)
                  & (kwg >= sw) & (kwg < sw + ks_w))          # (rows, HHW)
        bias_hw = jnp.where(inside, 0.0, NEG).astype(jnp.float32)
        if ks_d > 1:   # same (h,w) pattern repeats for each of the kd depth planes
            bias = jnp.concatenate([bias_hw] * ks_d, axis=1)  # (rows, HLs)
        else:
            bias = bias_hw

        # qk-scale was already folded into q by the QKV projection kernel.
        q_tile = q_ref[...].reshape(TL, C)
        wp_heads = [wp_ref[h * head_dim:(h + 1) * head_dim, :]
                    for h in range(num_heads)]

        ck.wait()
        cv.wait()

        outs = []
        for dd in range(td):                       # depth-plane sub-tiling
            sd = jnp.clip(ti * td + dd - rd, 0, D - ks_d)
            off = sd - d0                          # in [0, HD - ks_d] by construction
            k_slab = kbuf[pl.ds(off, ks_d), :, :, :].reshape(HLs, C)
            v_slab = vbuf[pl.ds(off, ks_d), :, :, :].reshape(HLs, C)
            q_p = q_tile[dd * rows:(dd + 1) * rows, :]
            acc = jnp.zeros((rows, C), jnp.float32)
            for h in range(num_heads):
                sl = slice(h * head_dim, (h + 1) * head_dim)
                logits = lax.dot_general(
                    q_p[:, sl], k_slab[:, sl], (((1,), (1,)), ((), ())),
                    preferred_element_type=jnp.float32) + bias     # (rows, HLs)
                m = jnp.max(logits, axis=-1, keepdims=True)
                p = jnp.exp(logits - m)
                denom = jnp.sum(p, axis=-1, keepdims=True)
                attn = (p * pl.reciprocal(denom, approx=True)).astype(v_slab.dtype)
                pv = jnp.dot(attn, v_slab[:, sl],
                             preferred_element_type=jnp.float32)   # (rows, head_dim)
                # Fused output projection: concat_h(pv_h) @ Wp == sum_h pv_h @ Wp[h]
                acc = acc + jnp.dot(pv, wp_heads[h],
                                    preferred_element_type=jnp.float32)
            outs.append(acc)
        full = (jnp.concatenate(outs, axis=0) if td > 1 else outs[0]) + bp_ref[...]
        o_ref[...] = full.reshape(1, td, th, W, C).astype(o_ref.dtype)

    return kernel


def na3d_attention_proj_pallas(q, k, v, w_proj, b_proj, *, kernel_size, num_heads, tiles):
    B, D, H, W, C = q.shape
    ks_d, ks_h, ks_w = kernel_size
    td, th = tiles
    assert D % td == 0 and H % th == 0
    assert td == D or td + ks_d - 1 <= D
    assert th == H or th + ks_h - 1 <= H
    HD = D if td == D else td + ks_d - 1
    HH = H if th == H else th + ks_h - 1
    head_dim = C // num_heads

    kernel = _make_na3d_attn_kernel(
        (D, H, W), kernel_size, (td, th), (HD, HH), num_heads, head_dim)

    return pl.pallas_call(
        kernel,
        out_shape=jax.ShapeDtypeStruct((B, D, H, W, C), q.dtype),
        grid=(B, D // td, H // th),
        in_specs=[
            pl.BlockSpec((1, td, th, W, C), lambda b, i, j: (b, i, j, 0, 0)),
            pl.BlockSpec(memory_space=pl.ANY),   # K stays in HBM; halo DMA'd manually
            pl.BlockSpec(memory_space=pl.ANY),   # V stays in HBM; halo DMA'd manually
            pl.BlockSpec((C, C), lambda b, i, j: (0, 0)),
            pl.BlockSpec((1, C), lambda b, i, j: (0, 0)),
        ],
        out_specs=pl.BlockSpec((1, td, th, W, C), lambda b, i, j: (b, i, j, 0, 0)),
        scratch_shapes=[
            pltpu.VMEM((HD, HH, W, C), k.dtype),
            pltpu.VMEM((HD, HH, W, C), v.dtype),
            pltpu.SemaphoreType.DMA((2,)),
        ],
        compiler_params=pltpu.CompilerParams(
            dimension_semantics=("parallel", "parallel", "parallel"),
            vmem_limit_bytes=48 * 1024 * 1024,   # fits every generation incl. v7x 64 MiB/TC
        ),
    )(q, k, v, w_proj, b_proj.reshape(1, C))


# ----------------------------------------------------------------------------
# Reference-only neighbor index construction (used by the pure-JAX reference)
# ----------------------------------------------------------------------------
def _axis_neighbors(length, k):
    r = k // 2
    i = np.arange(length)[:, None]
    j = np.arange(k)[None, :]
    start = np.clip(i - r, 0, length - k)
    return start + j


def build_neighbor_index(D, H, W, kernel_size):
    kd, kh, kw = kernel_size
    nd = _axis_neighbors(D, kd)
    nh = _axis_neighbors(H, kh)
    nw = _axis_neighbors(W, kw)
    idx = (nd[:, None, None, :, None, None] * H
           + nh[None, :, None, None, :, None]) * W \
          + nw[None, None, :, None, None, :]
    return idx.reshape(D * H * W, kd * kh * kw).astype(np.int32)


# ----------------------------------------------------------------------------
# Module wrapper
# ----------------------------------------------------------------------------
class NeighborhoodAttention3DPallas:
    def __init__(self, dim, num_heads, kernel_size, key,
                 qkv_bias=True, qk_scale=None, attn_tiles=None):
        assert dim % num_heads == 0
        assert all(k % 2 == 1 for k in kernel_size)
        self.dim = dim
        self.num_heads = num_heads
        self.head_dim = dim // num_heads
        self.scale = float(qk_scale or self.head_dim ** (-0.5))
        self.kernel_size = tuple(kernel_size)
        self.attn_tiles = attn_tiles

        k1, k2, k3, k4 = jax.random.split(key, 4)
        # nn.Linear(dim, 3*dim, bias=True): stored as (in, out)
        self.w_qkv = jax.random.normal(k1, (dim, 3 * dim), jnp.float32) * 0.02
        self.b_qkv = (jax.random.normal(k2, (3 * dim,), jnp.float32) * 0.02) if qkv_bias \
            else jnp.zeros((3 * dim,), jnp.float32)
        # nn.Linear(dim, dim)
        self.w_proj = jax.random.normal(k3, (dim, dim), jnp.float32) * 0.02
        self.b_proj = jax.random.normal(k4, (dim,), jnp.float32) * 0.02
        # rel_pos_bias=False -> rpb is None; attn_drop / proj_drop rates are 0 (identity)
        self.rpb = None

    def _tiles(self, D, H, W):
        ks_d, ks_h, _ = self.kernel_size
        if self.attn_tiles is not None:
            td, th = self.attn_tiles
        else:
            # th = H: halo slab contiguous over (H, W, C) per depth plane (long DMA runs)
            th = H
            td = 1
            for t in range(1, D + 1):
                if D % t == 0 and (t == D or t + ks_d - 1 <= D) and t * th * W <= 256:
                    td = t
        assert D % td == 0 and (td == D or td + ks_d - 1 <= D), (D, td, ks_d)
        assert H % th == 0 and (th == H or th + ks_h - 1 <= H), (H, th, ks_h)
        return td, th

    def __call__(self, x):
        B, D, H, W, C = x.shape
        assert C == self.dim
        kd, kh, kw = self.kernel_size
        assert kd <= D and kh <= H and kw <= W
        L = D * H * W
        # fused QKV projection; q comes out already scaled by qk-scale and q/k/v are
        # split directly (channel layout = heads*head_dim, the layout the attention
        # kernel and the fused output projection expect -> no transposes anywhere)
        q, k, v = qkv_linear_pallas(x.reshape(B * L, C), self.w_qkv, self.b_qkv, self.scale)
        q = q.reshape(B, D, H, W, C)
        k = k.reshape(B, D, H, W, C)
        v = v.reshape(B, D, H, W, C)
        td, th = self._tiles(D, H, W)
        # attention + output projection fused in one kernel (no extra HBM round trip)
        out = na3d_attention_proj_pallas(
            q, k, v, self.w_proj, self.b_proj,
            kernel_size=self.kernel_size, num_heads=self.num_heads, tiles=(td, th))
        return out                                           # (B, D, H, W, C)

    # pure-JAX reference (no Pallas) for correctness checking
    def reference(self, x):
        hp = lax.Precision.HIGHEST
        B, D, H, W, C = x.shape
        L = D * H * W
        x_flat = x.reshape(B * L, C)
        qkv = jnp.dot(x_flat, self.w_qkv, precision=hp) + self.b_qkv
        qkv = qkv.reshape(B, L, 3, self.num_heads, self.head_dim)
        qkv = jnp.transpose(qkv, (2, 0, 3, 1, 4))
        q, k, v = qkv[0] * self.scale, qkv[1], qkv[2]
        BH = B * self.num_heads
        q = q.reshape(BH, L, self.head_dim)
        k = k.reshape(BH, L, self.head_dim)
        v = v.reshape(BH, L, self.head_dim)
        nbr = jnp.asarray(build_neighbor_index(D, H, W, self.kernel_size))
        k_nbr = k[:, nbr, :]
        v_nbr = v[:, nbr, :]
        logits = jnp.einsum("blh,blkh->blk", q, k_nbr, precision=hp)
        attn = jax.nn.softmax(logits, axis=-1)
        out = jnp.einsum("blk,blkh->blh", attn, v_nbr, precision=hp)
        out = out.reshape(B, self.num_heads, L, self.head_dim)
        out = jnp.transpose(out, (0, 2, 1, 3)).reshape(B * L, C)
        out = jnp.dot(out, self.w_proj, precision=hp) + self.b_proj
        return out.reshape(B, D, H, W, C)


# ----------------------------------------------------------------------------
# Main
# ----------------------------------------------------------------------------
if __name__ == "__main__":
    key = jax.random.PRNGKey(0)
    kx, kp = jax.random.split(key)

    B, D, H, W, C = 2, 8, 8, 8, 32
    num_heads = 4
    kernel_size = (3, 3, 3)

    x = jax.random.normal(kx, (B, D, H, W, C), dtype=jnp.float32)
    module = NeighborhoodAttention3DPallas(C, num_heads, kernel_size, kp)

    # default tiling: th = H (contiguous halo), td chosen so TL = td*H*W == 256
    y = jax.block_until_ready(module(x))
    assert y.shape == (B, D, H, W, C)

    y_ref = module.reference(x)
    np.testing.assert_allclose(np.asarray(y), np.asarray(y_ref), rtol=2e-3, atol=2e-3)

    # second config exercises halo clamping along both the D and H axes
    module.attn_tiles = (4, 4)
    y2 = jax.block_until_ready(module(x))
    np.testing.assert_allclose(np.asarray(y2), np.asarray(y_ref), rtol=2e-3, atol=2e-3)

    print("KERNEL_OK")
</pallas_src>

<mosaic_0001>
module attributes {stable_mosaic.version = 11 : i64} {
  func.func @kernel(%arg0: i32, %arg1: memref<256x32xf32, #tpu.memory_space<vmem>>, %arg2: memref<32x96xf32, #tpu.memory_space<vmem>>, %arg3: memref<1x96xf32, #tpu.memory_space<vmem>>, %arg4: memref<256x32xf32, #tpu.memory_space<vmem>>, %arg5: memref<256x32xf32, #tpu.memory_space<vmem>>, %arg6: memref<256x32xf32, #tpu.memory_space<vmem>>) attributes {dimension_semantics = [#tpu.dimension_semantics<parallel>], iteration_bounds = array<i64: 4>, scalar_prefetch = 0 : i64, scratch_operands = 0 : i64, tpu.core_type = #tpu.core_type<tc>, window_params = [{transform_indices = @transform_0, window_bounds = array<i64: 256, 32>}, {pipeline_mode = #tpu.pipeline_mode<synchronous>, transform_indices = @transform_1, window_bounds = array<i64: 32, 96>}, {pipeline_mode = #tpu.pipeline_mode<synchronous>, transform_indices = @transform_2, window_bounds = array<i64: 1, 96>}, {transform_indices = @transform_3, window_bounds = array<i64: 256, 32>}, {transform_indices = @transform_4, window_bounds = array<i64: 256, 32>}, {transform_indices = @transform_5, window_bounds = array<i64: 256, 32>}]} {
    %c0 = arith.constant 0 : index
    %c0_0 = arith.constant 0 : index
    %0 = vector.load %arg1[%c0, %c0_0] : memref<256x32xf32, #tpu.memory_space<vmem>>, vector<256x32xf32>
    %c0_1 = arith.constant 0 : index
    %c0_2 = arith.constant 0 : index
    %1 = vector.load %arg2[%c0_1, %c0_2] : memref<32x96xf32, #tpu.memory_space<vmem>>, vector<32x96xf32>
    %cst = arith.constant dense<0.000000e+00> : vector<256x96xf32>
    %2 = tpu.matmul %0, %1, %cst {dimension_numbers = #tpu.dot_dimension_numbers<[1], [0], [0], [1], [0, 0, 1, 1], [], []>} : vector<256x32xf32>, vector<32x96xf32>, vector<256x96xf32> -> vector<256x96xf32>
    %c0_3 = arith.constant 0 : index
    %c0_4 = arith.constant 0 : index
    %3 = vector.load %arg3[%c0_3, %c0_4] : memref<1x96xf32, #tpu.memory_space<vmem>>, vector<1x96xf32>
    %4 = vector.broadcast %3 : vector<1x96xf32> to vector<256x96xf32>
    %5 = arith.addf %2, %4 : vector<256x96xf32>
    %6 = vector.extract_strided_slice %5 {offsets = [0, 0], sizes = [256, 32], strides = [1, 1]} : vector<256x96xf32> to vector<256x32xf32>
    %cst_5 = arith.constant 0.353553385 : f32
    %7 = vector.broadcast %cst_5 : f32 to vector<256x32xf32>
    %8 = arith.mulf %6, %7 : vector<256x32xf32>
    %c0_6 = arith.constant 0 : index
    %c0_7 = arith.constant 0 : index
    %9 = vector.load %arg4[%c0_6, %c0_7] : memref<256x32xf32, #tpu.memory_space<vmem>>, vector<256x32xf32>
    tpu.vector_store %arg4[%c0_6, %c0_7], %8 {strides = array<i32>} : memref<256x32xf32, #tpu.memory_space<vmem>>, vector<256x32xf32>,
    %10 = vector.extract_strided_slice %5 {offsets = [0, 32], sizes = [256, 32], strides = [1, 1]} : vector<256x96xf32> to vector<256x32xf32>
    %c0_8 = arith.constant 0 : index
    %c0_9 = arith.constant 0 : index
    %11 = vector.load %arg5[%c0_8, %c0_9] : memref<256x32xf32, #tpu.memory_space<vmem>>, vector<256x32xf32>
    tpu.vector_store %arg5[%c0_8, %c0_9], %10 {strides = array<i32>} : memref<256x32xf32, #tpu.memory_space<vmem>>, vector<256x32xf32>,
    %12 = vector.extract_strided_slice %5 {offsets = [0, 64], sizes = [256, 32], strides = [1, 1]} : vector<256x96xf32> to vector<256x32xf32>
    %c0_10 = arith.constant 0 : index
    %c0_11 = arith.constant 0 : index
    %13 = vector.load %arg6[%c0_10, %c0_11] : memref<256x32xf32, #tpu.memory_space<vmem>>, vector<256x32xf32>
    tpu.vector_store %arg6[%c0_10, %c0_11], %12 {strides = array<i32>} : memref<256x32xf32, #tpu.memory_space<vmem>>, vector<256x32xf32>,
    return
  }
  func.func @transform_0(%arg0: i32) -> (i32, i32) {
    %c0_i32 = arith.constant 0 : i32
    %c0_i32_0 = arith.constant 0 : i32
    return %arg0, %c0_i32 : i32, i32
  }
  func.func @transform_1(%arg0: i32) -> (i32, i32) {
    %c0_i32 = arith.constant 0 : i32
    %c0_i32_0 = arith.constant 0 : i32
    %c0_i32_1 = arith.constant 0 : i32
    return %c0_i32, %c0_i32_0 : i32, i32
  }
  func.func @transform_2(%arg0: i32) -> (i32, i32) {
    %c0_i32 = arith.constant 0 : i32
    %c0_i32_0 = arith.constant 0 : i32
    %c0_i32_1 = arith.constant 0 : i32
    return %c0_i32, %c0_i32_0 : i32, i32
  }
  func.func @transform_3(%arg0: i32) -> (i32, i32) {
    %c0_i32 = arith.constant 0 : i32
    %c0_i32_0 = arith.constant 0 : i32
    return %arg0, %c0_i32 : i32, i32
  }
  func.func @transform_4(%arg0: i32) -> (i32, i32) {
    %c0_i32 = arith.constant 0 : i32
    %c0_i32_0 = arith.constant 0 : i32
    return %arg0, %c0_i32 : i32, i32
  }
  func.func @transform_5(%arg0: i32) -> (i32, i32) {
    %c0_i32 = arith.constant 0 : i32
    %c0_i32_0 = arith.constant 0 : i32
    return %arg0, %c0_i32 : i32, i32
  }
}

</mosaic_0001>

<bundles_post_ra>
// kernel: tpu_custom_call.1
= control target key start
LH: loop header
LB: loop body
LE: loop exit
PB: predicated region body
PF: predicated region fallthrough
CT: control target
= control target key end

     0   :  { %s1298_s18 = smov 0   ;;  %s1849_s0 = inlined_call_operand.vmem [shape: f32[1024,32], index: 0, kind: input, shape index: {}]   ;;  %s1850_s1 = inlined_call_operand.vmem [shape: f32[32,96], index: 1, kind: input, shape index: {}]   ;;  %s1851_s2 = inlined_call_operand.vmem [shape: f32[1,96], index: 2, kind: input, shape index: {}]   ;;  %s1852_s3 = inlined_call_operand.vmem [shape: f32[1024,32], index: 3, kind: output, shape index: {0}]   ;;  %s1853_s4 = inlined_call_operand.vmem [shape: f32[1024,32], index: 4, kind: output, shape index: {1}]   ;;  %s1854_s5 = inlined_call_operand.vmem [shape: f32[1024,32], index: 5, kind: output, shape index: {2}]  }
   0x1 LB: > { %s1096_s19 = sadd.s32 4294967295, %s1264_s18   ;;  %p1100_p0 = scmp.ge.s32.totalorder %s1264_s18, 1  ;;  %s1264_s18 = sphi %s1298_s18, %s16_s18  }
   0x2   : > { %p193_p1 = scmp.lt.s32.totalorder %s1264_s18, 5 }
   0x4   : > { %p194_p2 = pnand %p1100_p0, %p193_p1 }
   0x5   : > { %v287_v0 = vld [vmem:[%s1850_s1] sm:$0xff] (!%p194_p2)  ;;  %v288_v1 = vld [vmem:[%s1850_s1 + $0x8] sm:$0xff] (!%p194_p2)  ;;  %v289_v2 = vld [vmem:[%s1850_s1 + $0x10] sm:$0xff] (!%p194_p2)  ;;  %s1101_s26 = sshll.u32 (!%p194_p2), %s1096_s19, 5  ;;  %vm298_vm0 = vcmask (!%p194_p2), 261120   ;;  %s1266_s13 = smov (!%p194_p2), 96  }
   0x6   : > { %197 = sbr.rel (%p194_p2) target bundleno = 473 (0x1d9), region = 32  ;;  %v1236_v3 = vpack.c.bf16 (!%p194_p2), %v288_v1, %v287_v0  ;;  %v290_v4 = vld [vmem:[%s1850_s1 + $0x18] sm:$0xff] (!%p194_p2)  ;;  %p232_p3 = scmp.lt.s32.totalorder (!%p194_p2), %s1101_s26, 127  ;;  %v1393_v38 = vld [vmem:[%s1851_s2] ss:$0 sm:$0xff] (!%p194_p2) }
   0x7   : > { %v1240_v5 = vpack.c.bf16 (!%p194_p2), %v290_v4, %v289_v2  ;;  %s1267_s14 = smov (!%p194_p2), 64  }
   0x8   : > { %1237 = vmatprep.subr.bf16.mxu0 (!%p194_p2), %v1236_v3  ;;  %1244 = vmatprep.subr.bf16.mxu1 (!%p194_p2), %v1236_v3 }
   0x9   : > { %1239 = vmatpush3.bf16.msra.mxu0 (!%p194_p2), %v1236_v3  ;;  %1246 = vmatpush3.bf16.msra.mxu1 (!%p194_p2), %v1236_v3 }
   0xa   : > { %1241 = vmatprep.subr.bf16.mxu0 (!%p194_p2), %v1240_v5  ;;  %1245 = vmatprep.subr.bf16.mxu1 (!%p194_p2), %v1240_v5 }
   0xd   : > { %s1856_s26 = smov (!%p232_p3, %s1101_s26), 127  ;;  %1243 = vmatpush3.bf16.msra.mxu0 %v1240_v5  ;;  %1247 = vmatpush3.bf16.msra.mxu1 %v1240_v5 }
   0xe   : > { %s1318_s29 = sshll.u32 %s1856_s26, 3 }
   0xf   : > { %s1324_s7 = scalar_lea.vmem %s1849_s0, %s1318_s29  ;;  %s1401_s12 = scalar_lea.vmem %s1852_s3, %s1318_s29 }
  0x10   : > { %v255_v6 = vld [vmem:[%s1324_s7] sm:$0xff]  ;;  %v256_v8 = vld [vmem:[%s1324_s7 + $0x8] sm:$0xff]  ;;  %v257_v10 = vld [vmem:[%s1324_s7 + $0x10] sm:$0xff]  ;;  %s1698_s17 = scalar_lea.vmem %s1853_s4, %s1318_s29  ;;  %s1712_s21 = scalar_lea.vmem %s1854_s5, %s1318_s29 }
  0x11   : > { %v271_v7 = vld [vmem:[%s1324_s7 + $0x80] sm:$0xff]  ;;  %v272_v9 = vld [vmem:[%s1324_s7 + $0x88] sm:$0xff]  ;;  %1188 = vmatprep.mubr.msk.f32.mxu0 %vm298_vm0, %v255_v6  ;;  %v273_v11 = vld [vmem:[%s1324_s7 + $0x90] sm:$0xff] }
  0x12   : > { %1212 = vmatprep.mubr.msk.f32.mxu1 %vm298_vm0, %v271_v7  ;;  %1189 = vmatmul.mubr.msk.f32.vlgmr.msra.gmra.mrb[0].mxu0 %vm298_vm0, %v256_v8  ;;  %v258_v12 = vld [vmem:[%s1324_s7 + $0x18] sm:$0xff]  ;;  %v259_v14 = vld [vmem:[%s1324_s7 + $0x20] sm:$0xff]  ;;  %v260_v16 = vld [vmem:[%s1324_s7 + $0x28] sm:$0xff] }
  0x13   : > { %1213 = vmatmul.mubr.msk.f32.vlgmr.msra.gmra.mrb[0].mxu1 %vm298_vm0, %v272_v9  ;;  %1191 = vmatprep.mubr.msk.f32.mxu0 %vm298_vm0, %v257_v10  ;;  %v274_v13 = vld [vmem:[%s1324_s7 + $0x98] sm:$0xff]  ;;  %v275_v15 = vld [vmem:[%s1324_s7 + $0xa0] sm:$0xff]  ;;  %v276_v17 = vld [vmem:[%s1324_s7 + $0xa8] sm:$0xff] }
  0x14   : > { %1215 = vmatprep.mubr.msk.f32.mxu1 %vm298_vm0, %v273_v11  ;;  %v261_v18 = vld [vmem:[%s1324_s7 + $0x30] sm:$0xff]  ;;  %v262_v20 = vld [vmem:[%s1324_s7 + $0x38] sm:$0xff]  ;;  %v263_v22 = vld [vmem:[%s1324_s7 + $0x40] sm:$0xff] }
  0x15   : > { %v277_v19 = vld [vmem:[%s1324_s7 + $0xb0] sm:$0xff]  ;;  %v278_v21 = vld [vmem:[%s1324_s7 + $0xb8] sm:$0xff]  ;;  %v279_v23 = vld [vmem:[%s1324_s7 + $0xc0] sm:$0xff] }
  0x16   : > { %1192 = vmatmul.mubr.msk.f32.gmra.mrb[2].mxu0 %vm298_vm0, %v258_v12  ;;  %v264_v24 = vld [vmem:[%s1324_s7 + $0x48] sm:$0xff]  ;;  %v265_v26 = vld [vmem:[%s1324_s7 + $0x50] sm:$0xff]  ;;  %v266_v28 = vld [vmem:[%s1324_s7 + $0x58] sm:$0xff] }
  0x17   : > { %1216 = vmatmul.mubr.msk.f32.gmra.mrb[2].mxu1 %vm298_vm0, %v274_v13  ;;  %1194 = vmatprep.mubr.msk.f32.mxu0 %vm298_vm0, %v259_v14  ;;  %v280_v25 = vld [vmem:[%s1324_s7 + $0xc8] sm:$0xff]  ;;  %v281_v27 = vld [vmem:[%s1324_s7 + $0xd0] sm:$0xff]  ;;  %v282_v29 = vld [vmem:[%s1324_s7 + $0xd8] sm:$0xff] }
  0x18   : > { %1218 = vmatprep.mubr.msk.f32.mxu1 %vm298_vm0, %v275_v15  ;;  %v267_v30 = vld [vmem:[%s1324_s7 + $0x60] sm:$0xff]  ;;  %v268_v32 = vld [vmem:[%s1324_s7 + $0x68] sm:$0xff]  ;;  %v269_v34 = vld [vmem:[%s1324_s7 + $0x70] sm:$0xff] }
  0x19   : > { %v283_v31 = vld [vmem:[%s1324_s7 + $0xe0] sm:$0xff]  ;;  %v284_v33 = vld [vmem:[%s1324_s7 + $0xe8] sm:$0xff]  ;;  %v285_v35 = vld [vmem:[%s1324_s7 + $0xf0] sm:$0xff] }
  0x1a   : > { %1195 = vmatmul.mubr.msk.f32.gmra.mrb[4].mxu0 %vm298_vm0, %v260_v16  ;;  %v270_v36 = vld [vmem:[%s1324_s7 + $0x78] sm:$0xff] }
  0x1b   : > { %1219 = vmatmul.mubr.msk.f32.gmra.mrb[4].mxu1 %vm298_vm0, %v276_v17  ;;  %1197 = vmatprep.mubr.msk.f32.mxu0 %vm298_vm0, %v261_v18  ;;  %v286_v37 = vld [vmem:[%s1324_s7 + $0xf8] sm:$0xff] }
  0x1c   : > { %1221 = vmatprep.mubr.msk.f32.mxu1 %vm298_vm0, %v277_v19 }
  0x1e   : > { %1198 = vmatmul.mubr.msk.f32.gmra.mrb[6].mxu0 %vm298_vm0, %v262_v20 }
  0x1f   : > { %1222 = vmatmul.mubr.msk.f32.gmra.mrb[6].mxu1 %vm298_vm0, %v278_v21  ;;  %1200 = vmatprep.mubr.msk.f32.mxu0 %vm298_vm0, %v263_v22 }
  0x20   : > { %1224 = vmatprep.mubr.msk.f32.mxu1 %vm298_vm0, %v279_v23 }
  0x22   : > { %1201 = vmatmul.mubr.msk.f32.gmra.mrb[8].mxu0 %vm298_vm0, %v264_v24 }
  0x23   : > { %1225 = vmatmul.mubr.msk.f32.gmra.mrb[8].mxu1 %vm298_vm0, %v280_v25  ;;  %1203 = vmatprep.mubr.msk.f32.mxu0 %vm298_vm0, %v265_v26 }
  0x24   : > { %1227 = vmatprep.mubr.msk.f32.mxu1 %vm298_vm0, %v281_v27 }
  0x26   : > { %1204 = vmatmul.mubr.msk.f32.gmra.mrb[10].mxu0 %vm298_vm0, %v266_v28 }
  0x27   : > { %1228 = vmatmul.mubr.msk.f32.gmra.mrb[10].mxu1 %vm298_vm0, %v282_v29  ;;  %1206 = vmatprep.mubr.msk.f32.mxu0 %vm298_vm0, %v267_v30 }
  0x28   : > { %1230 = vmatprep.mubr.msk.f32.mxu1 %vm298_vm0, %v283_v31 }
  0x2a   : > { %1207 = vmatmul.mubr.msk.f32.gmra.mrb[12].mxu0 %vm298_vm0, %v268_v32 }
  0x2b   : > { %1231 = vmatmul.mubr.msk.f32.gmra.mrb[12].mxu1 %vm298_vm0, %v284_v33  ;;  %1209 = vmatprep.mubr.msk.f32.mxu0 %vm298_vm0, %v269_v34 }
  0x2c   : > { %1233 = vmatprep.mubr.msk.f32.mxu1 %vm298_vm0, %v285_v35 }
  0x2e   : > { %1210 = vmatmul.mubr.msk.f32.gmra.mrb[14].mxu0 %vm298_vm0, %v270_v36 }
  0x2f   : > { %1234 = vmatmul.mubr.msk.f32.gmra.mrb[14].mxu1 %vm298_vm0, %v286_v37 }
  0xe5   : > { %v1190_v39 = vpop.f32.mrb[0].mxu0 }
  0xe6   : > { %v1214_v40 = vpop.f32.mrb[0].mxu1  ;;  %v467_v41 = vadd.f32 %v1190_v39, %v1393_v38  ;;  %v461_v43 = vpop.f32.mrb[1].mxu0 }
  0xe7   : > { %v547_v42 = vadd.f32 %v1214_v40, %v1393_v38  ;;  %v541_v44 = vpop.f32.mrb[1].mxu1  ;;  %v462_v45 = vadd.f32 %v1393_v38, %v461_v43 }
  0xe8   : > { %v1405_v46 = vadd.f32 %v1393_v38, %v541_v44  ;;  %v621_v47 = vmul.f32 0.35355338, %v467_v41  ;;  %718 = vrot.lane.b32.xlu0 %v467_v41, %s1266_s13 }
  0xe9   : > { %v637_v48 = vmul.f32 0.35355338, %v547_v42  ;;  %750 = vrot.lane.b32.xlu1 %v547_v42, %s1266_s13  ;;  %v620_v49 = vmul.f32 0.35355338, %v462_v45  ;;  %v1193_v51 = vpop.f32.mrb[2].mxu0 }
  0xea   : > { %v636_v50 = vmul.f32 0.35355338, %v1405_v46  ;;  %v1217_v52 = vpop.f32.mrb[2].mxu1  ;;  %653 = vst.msk [vmem:[%s1401_s12 + $0x8] sm:$0xff] %vm298_vm0, %v621_v47  ;;  %v1415_v53 = vadd.f32 %v1193_v51, %v1393_v38  ;;  %v471_v54 = vpop.f32.mrb[3].mxu0 }
  0xeb   : > { %669 = vst.msk [vmem:[%s1401_s12 + $0x88] sm:$0xff] %vm298_vm0, %v637_v48  ;;  %v1418_v55 = vadd.f32 %v1217_v52, %v1393_v38  ;;  %v551_v56 = vpop.f32.mrb[3].mxu1  ;;  %652 = vst.msk [vmem:[%s1401_s12] sm:$0xff] %vm298_vm0, %v620_v49  ;;  %v1425_v57 = vadd.f32 %v1393_v38, %v471_v54 }
  0xec   : > { %668 = vst.msk [vmem:[%s1401_s12 + $0x80] sm:$0xff] %vm298_vm0, %v636_v50  ;;  %v1428_v58 = vadd.f32 %v1393_v38, %v551_v56  ;;  %716 = vrot.lane.b32.xlu0 %v462_v45, %s1266_s13  ;;  %v623_v59 = vmul.f32 0.35355338, %v1415_v53 }
  0xed   : > { %846 = vrot.lane.b32.xlu1 %v467_v41, %s1267_s14  ;;  %v639_v60 = vmul.f32 0.35355338, %v1418_v55  ;;  %v622_v61 = vmul.f32 0.35355338, %v1425_v57  ;;  %v1196_v63 = vpop.f32.mrb[4].mxu0 }
  0xee   : > { %v638_v62 = vmul.f32 0.35355338, %v1428_v58  ;;  %v1220_v0 = vpop.f32.mrb[4].mxu1  ;;  %655 = vst.msk [vmem:[%s1401_s12 + $0x18] sm:$0xff] %vm298_vm0, %v623_v59  ;;  %v1441_v1 = vadd.f32 %v1196_v63, %v1393_v38  ;;  %v481_v2 = vpop.f32.mrb[5].mxu0 }
  0xef   : > { %671 = vst.msk [vmem:[%s1401_s12 + $0x98] sm:$0xff] %vm298_vm0, %v639_v60  ;;  %v1444_v3 = vadd.f32 %v1220_v0, %v1393_v38  ;;  %v561_v4 = vpop.f32.mrb[5].mxu1  ;;  %654 = vst.msk [vmem:[%s1401_s12 + $0x10] sm:$0xff] %vm298_vm0, %v622_v61  ;;  %v1451_v5 = vadd.f32 %v1393_v38, %v481_v2 }
  0xf0   : > { %670 = vst.msk [vmem:[%s1401_s12 + $0x90] sm:$0xff] %vm298_vm0, %v638_v62  ;;  %v1454_v6 = vadd.f32 %v1393_v38, %v561_v4  ;;  %748 = vrot.lane.b32.xlu0 %v1405_v46, %s1266_s13  ;;  %v625_v7 = vmul.f32 0.35355338, %v1441_v1 }
  0xf1   : > { %878 = vrot.lane.b32.xlu1 %v547_v42, %s1267_s14  ;;  %v641_v8 = vmul.f32 0.35355338, %v1444_v3  ;;  %v624_v9 = vmul.f32 0.35355338, %v1451_v5  ;;  %v1199_v11 = vpop.f32.mrb[6].mxu0 }
  0xf2   : > { %v640_v10 = vmul.f32 0.35355338, %v1454_v6  ;;  %v1223_v12 = vpop.f32.mrb[6].mxu1  ;;  %657 = vst.msk [vmem:[%s1401_s12 + $0x28] sm:$0xff] %vm298_vm0, %v625_v7  ;;  %v1468_v13 = vadd.f32 %v1199_v11, %v1393_v38  ;;  %v491_v14 = vpop.f32.mrb[7].mxu0 }
  0xf3   : > { %673 = vst.msk [vmem:[%s1401_s12 + $0xa8] sm:$0xff] %vm298_vm0, %v641_v8  ;;  %v1471_v15 = vadd.f32 %v1223_v12, %v1393_v38  ;;  %v571_v16 = vpop.f32.mrb[7].mxu1  ;;  %656 = vst.msk [vmem:[%s1401_s12 + $0x20] sm:$0xff] %vm298_vm0, %v624_v9  ;;  %v1478_v17 = vadd.f32 %v1393_v38, %v491_v14 }
  0xf4   : > { %672 = vst.msk [vmem:[%s1401_s12 + $0xa0] sm:$0xff] %vm298_vm0, %v640_v10  ;;  %v1481_v18 = vadd.f32 %v1393_v38, %v571_v16  ;;  %844 = vrot.lane.b32.xlu0 %v462_v45, %s1267_s14  ;;  %v627_v19 = vmul.f32 0.35355338, %v1468_v13 }
  0xf5   : > { %722 = vrot.lane.b32.xlu1 %v1415_v53, %s1266_s13  ;;  %v643_v20 = vmul.f32 0.35355338, %v1471_v15  ;;  %v626_v21 = vmul.f32 0.35355338, %v1478_v17  ;;  %v1202_v23 = vpop.f32.mrb[8].mxu0 }
  0xf6   : > { %v642_v22 = vmul.f32 0.35355338, %v1481_v18  ;;  %v1226_v24 = vpop.f32.mrb[8].mxu1  ;;  %659 = vst.msk [vmem:[%s1401_s12 + $0x38] sm:$0xff] %vm298_vm0, %v627_v19  ;;  %v1495_v25 = vadd.f32 %v1202_v23, %v1393_v38  ;;  %v501_v26 = vpop.f32.mrb[9].mxu0 }
  0xf7   : > { %675 = vst.msk [vmem:[%s1401_s12 + $0xb8] sm:$0xff] %vm298_vm0, %v643_v20  ;;  %v1498_v27 = vadd.f32 %v1226_v24, %v1393_v38  ;;  %v581_v28 = vpop.f32.mrb[9].mxu1  ;;  %658 = vst.msk [vmem:[%s1401_s12 + $0x30] sm:$0xff] %vm298_vm0, %v626_v21  ;;  %v1505_v29 = vadd.f32 %v1393_v38, %v501_v26 }
  0xf8   : > { %674 = vst.msk [vmem:[%s1401_s12 + $0xb0] sm:$0xff] %vm298_vm0, %v642_v22  ;;  %v1508_v30 = vadd.f32 %v1393_v38, %v581_v28  ;;  %876 = vrot.lane.b32.xlu0 %v1405_v46, %s1267_s14  ;;  %v629_v31 = vmul.f32 0.35355338, %v1495_v25 }
  0xf9   : > { %754 = vrot.lane.b32.xlu1 %v1418_v55, %s1266_s13  ;;  %v645_v32 = vmul.f32 0.35355338, %v1498_v27  ;;  %v628_v33 = vmul.f32 0.35355338, %v1505_v29  ;;  %v1205_v35 = vpop.f32.mrb[10].mxu0 }
  0xfa   : > { %v644_v34 = vmul.f32 0.35355338, %v1508_v30  ;;  %v1229_v36 = vpop.f32.mrb[10].mxu1  ;;  %661 = vst.msk [vmem:[%s1401_s12 + $0x48] sm:$0xff] %vm298_vm0, %v629_v31  ;;  %v1523_v37 = vadd.f32 %v1205_v35, %v1393_v38  ;;  %v511_v39 = vpop.f32.mrb[11].mxu0 }
  0xfb   : > { %677 = vst.msk [vmem:[%s1401_s12 + $0xc8] sm:$0xff] %vm298_vm0, %v645_v32  ;;  %v1526_v40 = vadd.f32 %v1229_v36, %v1393_v38  ;;  %v591_v41 = vpop.f32.mrb[11].mxu1  ;;  %660 = vst.msk [vmem:[%s1401_s12 + $0x40] sm:$0xff] %vm298_vm0, %v628_v33  ;;  %v1533_v42 = vadd.f32 %v1393_v38, %v511_v39 }
  0xfc   : > { %676 = vst.msk [vmem:[%s1401_s12 + $0xc0] sm:$0xff] %vm298_vm0, %v644_v34  ;;  %v1536_v43 = vadd.f32 %v1393_v38, %v591_v41  ;;  %752 = vrot.lane.b32.xlu0 %v1428_v58, %s1266_s13  ;;  %v631_v44 = vmul.f32 0.35355338, %v1523_v37 }
  0xfd   : > { %850 = vrot.lane.b32.xlu1 %v1415_v53, %s1267_s14  ;;  %v647_v45 = vmul.f32 0.35355338, %v1526_v40  ;;  %v630_v46 = vmul.f32 0.35355338, %v1533_v42  ;;  %v1208_v48 = vpop.f32.mrb[12].mxu0 }
  0xfe   : > { %v646_v47 = vmul.f32 0.35355338, %v1536_v43  ;;  %v1232_v49 = vpop.f32.mrb[12].mxu1  ;;  %663 = vst.msk [vmem:[%s1401_s12 + $0x58] sm:$0xff] %vm298_vm0, %v631_v44  ;;  %v1551_v50 = vadd.f32 %v1208_v48, %v1393_v38  ;;  %v521_v51 = vpop.f32.mrb[13].mxu0 }
  0xff   : > { %679 = vst.msk [vmem:[%s1401_s12 + $0xd8] sm:$0xff] %vm298_vm0, %v647_v45  ;;  %v1554_v52 = vadd.f32 %v1232_v49, %v1393_v38  ;;  %v601_v53 = vpop.f32.mrb[13].mxu1  ;;  %662 = vst.msk [vmem:[%s1401_s12 + $0x50] sm:$0xff] %vm298_vm0, %v630_v46  ;;  %v1561_v54 = vadd.f32 %v1393_v38, %v521_v51 }
 0x100   : > { %678 = vst.msk [vmem:[%s1401_s12 + $0xd0] sm:$0xff] %vm298_vm0, %v646_v47  ;;  %v1564_v56 = vadd.f32 %v1393_v38, %v601_v53  ;;  %848 = vrot.lane.b32.xlu0 %v1425_v57, %s1267_s14  ;;  %v633_v59 = vmul.f32 0.35355338, %v1551_v50 }
 0x101   : > { %882 = vrot.lane.b32.xlu1 %v1418_v55, %s1267_s14  ;;  %v649_v60 = vmul.f32 0.35355338, %v1554_v52  ;;  %v632_v61 = vmul.f32 0.35355338, %v1561_v54  ;;  %v1211_v63 = vpop.f32.mrb[14].mxu0 }
 0x102   : > { %v648_v62 = vmul.f32 0.35355338, %v1564_v56  ;;  %v1235_v0 = vpop.f32.mrb[14].mxu1  ;;  %665 = vst.msk [vmem:[%s1401_s12 + $0x68] sm:$0xff] %vm298_vm0, %v633_v59  ;;  %v1579_v55 = vadd.f32 %v1211_v63, %v1393_v38  ;;  %v531_v2 = vpop.f32.mrb[15].mxu0 }
 0x103   : > { %681 = vst.msk [vmem:[%s1401_s12 + $0xe8] sm:$0xff] %vm298_vm0, %v649_v60  ;;  %v1582_v4 = vadd.f32 %v1235_v0, %v1393_v38  ;;  %v611_v7 = vpop.f32.mrb[15].mxu1  ;;  %664 = vst.msk [vmem:[%s1401_s12 + $0x60] sm:$0xff] %vm298_vm0, %v632_v61  ;;  %v1589_v8 = vadd.f32 %v1393_v38, %v531_v2 }
 0x104   : > { %680 = vst.msk [vmem:[%s1401_s12 + $0xe0] sm:$0xff] %vm298_vm0, %v648_v62  ;;  %v1592_v9 = vadd.f32 %v1393_v38, %v611_v7  ;;  %880 = vrot.lane.b32.xlu0 %v1428_v58, %s1267_s14  ;;  %v635_v10 = vmul.f32 0.35355338, %v1579_v55 }
 0x105   : > { %720 = vrot.lane.b32.xlu1 %v1425_v57, %s1266_s13  ;;  %v651_v11 = vmul.f32 0.35355338, %v1582_v4  ;;  %v634_v12 = vmul.f32 0.35355338, %v1589_v8 }
 0x106   : > { %v650_v14 = vmul.f32 0.35355338, %v1592_v9  ;;  %667 = vst.msk [vmem:[%s1401_s12 + $0x78] sm:$0xff] %vm298_vm0, %v635_v10 }
 0x107   : > { %683 = vst.msk [vmem:[%s1401_s12 + $0xf8] sm:$0xff] %vm298_vm0, %v651_v11  ;;  %666 = vst.msk [vmem:[%s1401_s12 + $0x70] sm:$0xff] %vm298_vm0, %v634_v12 }
 0x108   : > { %682 = vst.msk [vmem:[%s1401_s12 + $0xf0] sm:$0xff] %vm298_vm0, %v650_v14  ;;  %724 = vrot.lane.b32.xlu0 %v1451_v5, %s1266_s13 }
 0x109   : > { %726 = vrot.lane.b32.xlu1 %v1441_v1, %s1266_s13 }
 0x10c   : > { %756 = vrot.lane.b32.xlu0 %v1454_v6, %s1266_s13 }
 0x10d   : > { %758 = vrot.lane.b32.xlu1 %v1444_v3, %s1266_s13 }
 0x110   : > { %852 = vrot.lane.b32.xlu0 %v1451_v5, %s1267_s14 }
 0x111   : > { %854 = vrot.lane.b32.xlu1 %v1441_v1, %s1267_s14 }
 0x114   : > { %884 = vrot.lane.b32.xlu0 %v1454_v6, %s1267_s14 }
 0x115   : > { %886 = vrot.lane.b32.xlu1 %v1444_v3, %s1267_s14 }
 0x118   : > { %728 = vrot.lane.b32.xlu0 %v1478_v17, %s1266_s13 }
 0x119   : > { %730 = vrot.lane.b32.xlu1 %v1468_v13, %s1266_s13 }
 0x11c   : > { %760 = vrot.lane.b32.xlu0 %v1481_v18, %s1266_s13 }
 0x11d   : > { %762 = vrot.lane.b32.xlu1 %v1471_v15, %s1266_s13 }
 0x120   : > { %856 = vrot.lane.b32.xlu0 %v1478_v17, %s1267_s14 }
 0x121   : > { %858 = vrot.lane.b32.xlu1 %v1468_v13, %s1267_s14 }
 0x124   : > { %888 = vrot.lane.b32.xlu0 %v1481_v18, %s1267_s14 }
 0x125   : > { %890 = vrot.lane.b32.xlu1 %v1471_v15, %s1267_s14 }
 0x128   : > { %732 = vrot.lane.b32.xlu0 %v1505_v29, %s1266_s13 }
 0x129   : > { %734 = vrot.lane.b32.xlu1 %v1495_v25, %s1266_s13 }
 0x12c   : > { %764 = vrot.lane.b32.xlu0 %v1508_v30, %s1266_s13 }
 0x12d   : > { %766 = vrot.lane.b32.xlu1 %v1498_v27, %s1266_s13 }
 0x130   : > { %860 = vrot.lane.b32.xlu0 %v1505_v29, %s1267_s14 }
 0x131   : > { %862 = vrot.lane.b32.xlu1 %v1495_v25, %s1267_s14 }
 0x134   : > { %892 = vrot.lane.b32.xlu0 %v1508_v30, %s1267_s14 }
 0x135   : > { %894 = vrot.lane.b32.xlu1 %v1498_v27, %s1267_s14 }
 0x138   : > { %736 = vrot.lane.b32.xlu0 %v1533_v42, %s1266_s13 }
 0x139   : > { %738 = vrot.lane.b32.xlu1 %v1523_v37, %s1266_s13 }
 0x13c   : > { %768 = vrot.lane.b32.xlu0 %v1536_v43, %s1266_s13 }
 0x13d   : > { %770 = vrot.lane.b32.xlu1 %v1526_v40, %s1266_s13 }
 0x140   : > { %864 = vrot.lane.b32.xlu0 %v1533_v42, %s1267_s14 }
 0x141   : > { %866 = vrot.lane.b32.xlu1 %v1523_v37, %s1267_s14 }
 0x144   : > { %896 = vrot.lane.b32.xlu0 %v1536_v43, %s1267_s14 }
 0x145   : > { %898 = vrot.lane.b32.xlu1 %v1526_v40, %s1267_s14 }
 0x148   : > { %740 = vrot.lane.b32.xlu0 %v1561_v54, %s1266_s13 }
 0x149   : > { %742 = vrot.lane.b32.xlu1 %v1551_v50, %s1266_s13 }
 0x14c   : > { %772 = vrot.lane.b32.xlu0 %v1564_v56, %s1266_s13 }
 0x14d   : > { %774 = vrot.lane.b32.xlu1 %v1554_v52, %s1266_s13 }
 0x150   : > { %868 = vrot.lane.b32.xlu0 %v1561_v54, %s1267_s14 }
 0x151   : > { %870 = vrot.lane.b32.xlu1 %v1551_v50, %s1267_s14 }
 0x154   : > { %900 = vrot.lane.b32.xlu0 %v1564_v56, %s1267_s14 }
 0x155   : > { %902 = vrot.lane.b32.xlu1 %v1554_v52, %s1267_s14 }
 0x158   : > { %744 = vrot.lane.b32.xlu0 %v1589_v8, %s1266_s13 }
 0x159   : > { %746 = vrot.lane.b32.xlu1 %v1579_v55, %s1266_s13 }
 0x15a   : > { %v719_v57 = vpop.permute.xlu0 %718 }
 0x15b   : > { %v751_v38 = vpop.permute.xlu1 %750  ;;  %813 = vst.msk [vmem:[%s1698_s17 + $0x8] sm:$0xff] %vm298_vm0, %v719_v57 }
 0x15c   : > { %829 = vst.msk [vmem:[%s1698_s17 + $0x88] sm:$0xff] %vm298_vm0, %v751_v38  ;;  %776 = vrot.lane.b32.xlu0 %v1592_v9, %s1266_s13 }
 0x15d   : > { %778 = vrot.lane.b32.xlu1 %v1582_v4, %s1266_s13 }
 0x15e   : > { %v717_v1 = vpop.permute.xlu0 %716 }
 0x15f   : > { %v847_v58 = vpop.permute.xlu1 %846  ;;  %812 = vst.msk [vmem:[%s1698_s17] sm:$0xff] %vm298_vm0, %v717_v1 }
 0x160   : > { %941 = vst.msk [vmem:[%s1712_s21 + $0x8] sm:$0xff] %vm298_vm0, %v847_v58  ;;  %872 = vrot.lane.b32.xlu0 %v1589_v8, %s1267_s14 }
 0x161   : > { %874 = vrot.lane.b32.xlu1 %v1579_v55, %s1267_s14 }
 0x162   : > { %v749_v5 = vpop.permute.xlu0 %748 }
 0x163   : > { %v879_v3 = vpop.permute.xlu1 %878  ;;  %828 = vst.msk [vmem:[%s1698_s17 + $0x80] sm:$0xff] %vm298_vm0, %v749_v5 }
 0x164   : > { %957 = vst.msk [vmem:[%s1712_s21 + $0x88] sm:$0xff] %vm298_vm0, %v879_v3  ;;  %904 = vrot.lane.b32.xlu0 %v1592_v9, %s1267_s14 }
 0x165   : > { %906 = vrot.lane.b32.xlu1 %v1582_v4, %s1267_s14 }
 0x166   : > { %v845_v13 = vpop.permute.xlu0 %844 }
 0x167   : > { %v723_v6 = vpop.permute.xlu1 %722  ;;  %940 = vst.msk [vmem:[%s1712_s21] sm:$0xff] %vm298_vm0, %v845_v13 }
 0x168   : > { %815 = vst.msk [vmem:[%s1698_s17 + $0x18] sm:$0xff] %vm298_vm0, %v723_v6 }
 0x16a   : > { %v877_v16 = vpop.permute.xlu0 %876 }
 0x16b   : > { %v755_v15 = vpop.permute.xlu1 %754  ;;  %956 = vst.msk [vmem:[%s1712_s21 + $0x80] sm:$0xff] %vm298_vm0, %v877_v16 }
 0x16c   : > { %831 = vst.msk [vmem:[%s1698_s17 + $0x98] sm:$0xff] %vm298_vm0, %v755_v15 }
 0x16e   : > { %v753_v18 = vpop.permute.xlu0 %752 }
 0x16f   : > { %v851_v17 = vpop.permute.xlu1 %850  ;;  %830 = vst.msk [vmem:[%s1698_s17 + $0x90] sm:$0xff] %vm298_vm0, %v753_v18 }
 0x170   : > { %943 = vst.msk [vmem:[%s1712_s21 + $0x18] sm:$0xff] %vm298_vm0, %v851_v17 }
 0x172   : > { %v849_v20 = vpop.permute.xlu0 %848 }
 0x173   : > { %v883_v19 = vpop.permute.xlu1 %882  ;;  %942 = vst.msk [vmem:[%s1712_s21 + $0x10] sm:$0xff] %vm298_vm0, %v849_v20 }
 0x174   : > { %959 = vst.msk [vmem:[%s1712_s21 + $0x98] sm:$0xff] %vm298_vm0, %v883_v19 }
 0x176   : > { %v881_v22 = vpop.permute.xlu0 %880 }
 0x177   : > { %v721_v21 = vpop.permute.xlu1 %720  ;;  %958 = vst.msk [vmem:[%s1712_s21 + $0x90] sm:$0xff] %vm298_vm0, %v881_v22 }
 0x178   : > { %814 = vst.msk [vmem:[%s1698_s17 + $0x10] sm:$0xff] %vm298_vm0, %v721_v21 }
 0x17a   : > { %v725_v24 = vpop.permute.xlu0 %724 }
 0x17b   : > { %v727_v23 = vpop.permute.xlu1 %726  ;;  %816 = vst.msk [vmem:[%s1698_s17 + $0x20] sm:$0xff] %vm298_vm0, %v725_v24 }
 0x17c   : > { %817 = vst.msk [vmem:[%s1698_s17 + $0x28] sm:$0xff] %vm298_vm0, %v727_v23 }
 0x17e   : > { %v757_v26 = vpop.permute.xlu0 %756 }
 0x17f   : > { %v759_v25 = vpop.permute.xlu1 %758  ;;  %832 = vst.msk [vmem:[%s1698_s17 + $0xa0] sm:$0xff] %vm298_vm0, %v757_v26 }
 0x180   : > { %833 = vst.msk [vmem:[%s1698_s17 + $0xa8] sm:$0xff] %vm298_vm0, %v759_v25 }
 0x182   : > { %v853_v28 = vpop.permute.xlu0 %852 }
 0x183   : > { %v855_v27 = vpop.permute.xlu1 %854  ;;  %944 = vst.msk [vmem:[%s1712_s21 + $0x20] sm:$0xff] %vm298_vm0, %v853_v28 }
 0x184   : > { %945 = vst.msk [vmem:[%s1712_s21 + $0x28] sm:$0xff] %vm298_vm0, %v855_v27 }
 0x186   : > { %v885_v30 = vpop.permute.xlu0 %884 }
 0x187   : > { %v887_v29 = vpop.permute.xlu1 %886  ;;  %960 = vst.msk [vmem:[%s1712_s21 + $0xa0] sm:$0xff] %vm298_vm0, %v885_v30 }
 0x188   : > { %961 = vst.msk [vmem:[%s1712_s21 + $0xa8] sm:$0xff] %vm298_vm0, %v887_v29 }
 0x18a   : > { %v729_v32 = vpop.permute.xlu0 %728 }
 0x18b   : > { %v731_v31 = vpop.permute.xlu1 %730  ;;  %818 = vst.msk [vmem:[%s1698_s17 + $0x30] sm:$0xff] %vm298_vm0, %v729_v32 }
 0x18c   : > { %819 = vst.msk [vmem:[%s1698_s17 + $0x38] sm:$0xff] %vm298_vm0, %v731_v31 }
 0x18e   : > { %v761_v34 = vpop.permute.xlu0 %760 }
 0x18f   : > { %v763_v33 = vpop.permute.xlu1 %762  ;;  %834 = vst.msk [vmem:[%s1698_s17 + $0xb0] sm:$0xff] %vm298_vm0, %v761_v34 }
 0x190   : > { %835 = vst.msk [vmem:[%s1698_s17 + $0xb8] sm:$0xff] %vm298_vm0, %v763_v33 }
 0x192   : > { %v857_v36 = vpop.permute.xlu0 %856 }
 0x193   : > { %v859_v35 = vpop.permute.xlu1 %858  ;;  %946 = vst.msk [vmem:[%s1712_s21 + $0x30] sm:$0xff] %vm298_vm0, %v857_v36 }
 0x194   : > { %947 = vst.msk [vmem:[%s1712_s21 + $0x38] sm:$0xff] %vm298_vm0, %v859_v35 }
 0x196   : > { %v889_v39 = vpop.permute.xlu0 %888 }
 0x197   : > { %v891_v37 = vpop.permute.xlu1 %890  ;;  %962 = vst.msk [vmem:[%s1712_s21 + $0xb0] sm:$0xff] %vm298_vm0, %v889_v39 }
 0x198   : > { %963 = vst.msk [vmem:[%s1712_s21 + $0xb8] sm:$0xff] %vm298_vm0, %v891_v37 }
 0x19a   : > { %v733_v41 = vpop.permute.xlu0 %732 }
 0x19b   : > { %v735_v40 = vpop.permute.xlu1 %734  ;;  %820 = vst.msk [vmem:[%s1698_s17 + $0x40] sm:$0xff] %vm298_vm0, %v733_v41 }
 0x19c   : > { %821 = vst.msk [vmem:[%s1698_s17 + $0x48] sm:$0xff] %vm298_vm0, %v735_v40 }
 0x19e   : > { %v765_v43 = vpop.permute.xlu0 %764 }
 0x19f   : > { %v767_v42 = vpop.permute.xlu1 %766  ;;  %836 = vst.msk [vmem:[%s1698_s17 + $0xc0] sm:$0xff] %vm298_vm0, %v765_v43 }
 0x1a0   : > { %837 = vst.msk [vmem:[%s1698_s17 + $0xc8] sm:$0xff] %vm298_vm0, %v767_v42 }
 0x1a2   : > { %v861_v45 = vpop.permute.xlu0 %860 }
 0x1a3   : > { %v863_v44 = vpop.permute.xlu1 %862  ;;  %948 = vst.msk [vmem:[%s1712_s21 + $0x40] sm:$0xff] %vm298_vm0, %v861_v45 }
 0x1a4   : > { %949 = vst.msk [vmem:[%s1712_s21 + $0x48] sm:$0xff] %vm298_vm0, %v863_v44 }
 0x1a6   : > { %v893_v47 = vpop.permute.xlu0 %892 }
 0x1a7   : > { %v895_v46 = vpop.permute.xlu1 %894  ;;  %964 = vst.msk [vmem:[%s1712_s21 + $0xc0] sm:$0xff] %vm298_vm0, %v893_v47 }
 0x1a8   : > { %965 = vst.msk [vmem:[%s1712_s21 + $0xc8] sm:$0xff] %vm298_vm0, %v895_v46 }
 0x1aa   : > { %v737_v49 = vpop.permute.xlu0 %736 }
 0x1ab   : > { %v739_v48 = vpop.permute.xlu1 %738  ;;  %822 = vst.msk [vmem:[%s1698_s17 + $0x50] sm:$0xff] %vm298_vm0, %v737_v49 }
 0x1ac   : > { %823 = vst.msk [vmem:[%s1698_s17 + $0x58] sm:$0xff] %vm298_vm0, %v739_v48 }
 0x1ae   : > { %v769_v51 = vpop.permute.xlu0 %768 }
 0x1af   : > { %v771_v50 = vpop.permute.xlu1 %770  ;;  %838 = vst.msk [vmem:[%s1698_s17 + $0xd0] sm:$0xff] %vm298_vm0, %v769_v51 }
 0x1b0   : > { %839 = vst.msk [vmem:[%s1698_s17 + $0xd8] sm:$0xff] %vm298_vm0, %v771_v50 }
 0x1b2   : > { %v865_v53 = vpop.permute.xlu0 %864 }
 0x1b3   : > { %v867_v52 = vpop.permute.xlu1 %866  ;;  %950 = vst.msk [vmem:[%s1712_s21 + $0x50] sm:$0xff] %vm298_vm0, %v865_v53 }
 0x1b4   : > { %951 = vst.msk [vmem:[%s1712_s21 + $0x58] sm:$0xff] %vm298_vm0, %v867_v52 }
 0x1b6   : > { %v897_v56 = vpop.permute.xlu0 %896 }
 0x1b7   : > { %v899_v54 = vpop.permute.xlu1 %898  ;;  %966 = vst.msk [vmem:[%s1712_s21 + $0xd0] sm:$0xff] %vm298_vm0, %v897_v56 }
 0x1b8   : > { %967 = vst.msk [vmem:[%s1712_s21 + $0xd8] sm:$0xff] %vm298_vm0, %v899_v54 }
 0x1ba   : > { %v741_v60 = vpop.permute.xlu0 %740 }
 0x1bb   : > { %v743_v59 = vpop.permute.xlu1 %742  ;;  %824 = vst.msk [vmem:[%s1698_s17 + $0x60] sm:$0xff] %vm298_vm0, %v741_v60 }
 0x1bc   : > { %825 = vst.msk [vmem:[%s1698_s17 + $0x68] sm:$0xff] %vm298_vm0, %v743_v59 }
 0x1be   : > { %v773_v62 = vpop.permute.xlu0 %772 }
 0x1bf   : > { %v775_v61 = vpop.permute.xlu1 %774  ;;  %840 = vst.msk [vmem:[%s1698_s17 + $0xe0] sm:$0xff] %vm298_vm0, %v773_v62 }
 0x1c0   : > { %841 = vst.msk [vmem:[%s1698_s17 + $0xe8] sm:$0xff] %vm298_vm0, %v775_v61 }
 0x1c2   : > { %v869_v0 = vpop.permute.xlu0 %868 }
 0x1c3   : > { %v871_v63 = vpop.permute.xlu1 %870  ;;  %952 = vst.msk [vmem:[%s1712_s21 + $0x60] sm:$0xff] %vm298_vm0, %v869_v0 }
 0x1c4   : > { %953 = vst.msk [vmem:[%s1712_s21 + $0x68] sm:$0xff] %vm298_vm0, %v871_v63 }
 0x1c6   : > { %v901_v2 = vpop.permute.xlu0 %900 }
 0x1c7   : > { %v903_v55 = vpop.permute.xlu1 %902  ;;  %968 = vst.msk [vmem:[%s1712_s21 + $0xe0] sm:$0xff] %vm298_vm0, %v901_v2 }
 0x1c8   : > { %969 = vst.msk [vmem:[%s1712_s21 + $0xe8] sm:$0xff] %vm298_vm0, %v903_v55 }
 0x1ca   : > { %v745_v7 = vpop.permute.xlu0 %744 }
 0x1cb   : > { %v747_v4 = vpop.permute.xlu1 %746  ;;  %826 = vst.msk [vmem:[%s1698_s17 + $0x70] sm:$0xff] %vm298_vm0, %v745_v7 }
 0x1cc   : > { %827 = vst.msk [vmem:[%s1698_s17 + $0x78] sm:$0xff] %vm298_vm0, %v747_v4 }
 0x1ce   : > { %v777_v9 = vpop.permute.xlu0 %776 }
 0x1cf   : > { %v779_v8 = vpop.permute.xlu1 %778  ;;  %842 = vst.msk [vmem:[%s1698_s17 + $0xf0] sm:$0xff] %vm298_vm0, %v777_v9 }
 0x1d0   : > { %843 = vst.msk [vmem:[%s1698_s17 + $0xf8] sm:$0xff] %vm298_vm0, %v779_v8 }
 0x1d2   : > { %v873_v11 = vpop.permute.xlu0 %872 }
 0x1d3   : > { %v875_v10 = vpop.permute.xlu1 %874  ;;  %954 = vst.msk [vmem:[%s1712_s21 + $0x70] sm:$0xff] %vm298_vm0, %v873_v11 }
 0x1d4   : > { %955 = vst.msk [vmem:[%s1712_s21 + $0x78] sm:$0xff] %vm298_vm0, %v875_v10 }
 0x1d6   : > { %v905_v14 = vpop.permute.xlu0 %904 }
 0x1d7   : > { %v907_v12 = vpop.permute.xlu1 %906  ;;  %970 = vst.msk [vmem:[%s1712_s21 + $0xf0] sm:$0xff] %vm298_vm0, %v905_v14 }
 0x1d8   : > { %971 = vst.msk [vmem:[%s1712_s21 + $0xf8] sm:$0xff] %vm298_vm0, %v907_v12 }
 0x1d9 PF: > { %s16_s18 = sadd.s32 1, %s1264_s18  }
 0x1da   : > { %p13_p4 = scmp.ge.s32.totalorder %s16_s18, 6  }
 0x1dc   :  { %15 = sbr.rel (!%p13_p4) target bundleno = 1 (0x1), region = 86 }

</bundles_post_ra>
